<compile_context>
chip_gen: v7x
topology: tpu7x:2x2x1
jax: 0.10.0
libtpu: 0.0.40
codegen_flags: <defaults>
</compile_context>

<pallas_src>
import math

import jax
import jax.numpy as jnp
from jax.experimental import pallas as pl
from jax.experimental.pallas import tpu as pltpu


def _round_up(x, m):
    return ((x + m - 1) // m) * m


def _make_kernel(hidden_dim, a_pad):
    H, AP = hidden_dim, a_pad

    def kernel(x_ref, w1_ref, w2_ref, w3_ref, b_ref, out_ref):
        wdt = w1_ref.dtype                      # matmul operand dtype (f32 or bf16)

        bias = b_ref[...].astype(jnp.float32)   # (4, L) lane-padded bias rows
        b1 = bias[0:1, :H]
        b2 = bias[1:2, :H]
        b3m = bias[2:3, :AP]
        b3v = bias[3:4, :AP]

        x = x_ref[...]
        if x.dtype != wdt:
            x = x.astype(wdt)

        # linear_1 -> leaky_relu(0.001)
        h = jnp.dot(x, w1_ref[...], preferred_element_type=jnp.float32) + b1
        h = jnp.where(h >= 0, h, 0.001 * h)

        # TODO(synk): nn.Dropout(p=do_rate) is treated as eval-mode identity here;
        #             a training-mode mask would use pltpu.prng_seed/prng_random_bits.

        # linear_2 -> leaky_relu(0.001)
        h = jnp.dot(h.astype(wdt), w2_ref[...],
                    preferred_element_type=jnp.float32) + b2
        h = jnp.where(h >= 0, h, 0.001 * h)

        # fused heads [W3m | W3v], each padded to AP (multiple of 128) lanes
        head = jnp.dot(h.astype(wdt), w3_ref[...],
                       preferred_element_type=jnp.float32)

        # lane-aligned split: tanh over the mean half only, exp over the
        # variance half only; each transcendental touches half the slab and both
        # stores are 128-lane aligned and dense.
        out_ref[:, :AP] = jnp.tanh(head[:, :AP] + b3m)
        out_ref[:, AP:] = jnp.exp(head[:, AP:] + b3v)

    return kernel


def policy_forward(x, packed_params, hidden_dim, action_dim, *, batch_tile=512):
    """Returns (x_m, x_v) exactly like policy_continuous(uncertain=True).forward."""
    w1, w2, w3, bp = packed_params
    B, S = x.shape
    H, A = hidden_dim, action_dim
    AP = w3.shape[1] // 2                       # lane-padded per-head width
    assert AP % 128 == 0 and AP >= A
    assert w1.shape == (S, H) and w2.shape == (H, H) and w3.shape == (H, 2 * AP)
    assert bp.shape[0] == 4 and bp.shape[1] >= max(H, AP)

    # Batch tile: whole batch when tiny; otherwise at least 2 blocks so the
    # "parallel" axis really shards across v7x's two TensorCores, rows a
    # multiple of 8, capped at batch_tile (amortizes per-step overhead).
    if B < 16:
        TB = B
    else:
        TB = min(batch_tile, _round_up((B + 1) // 2, 8))
    nb = pl.cdiv(B, TB)

    # x is the only per-step streamed tensor: match it to the weight dtype so
    # the bf16 path halves its HBM->VMEM DMA and skips a per-tile VPU cast.
    x_in = x if x.dtype == w1.dtype else x.astype(w1.dtype)

    nbytes = lambda a: int(a.size) * int(a.dtype.itemsize)
    weight_bytes = nbytes(w1) + nbytes(w2) + nbytes(w3) + nbytes(bp)  # Buffered(1)
    io_bytes = 2 * (TB * S * int(x_in.dtype.itemsize) + TB * 2 * AP * 4)
    vmem_limit = int(min(64 << 20, max(32 << 20,
                                       weight_bytes + io_bytes + (8 << 20))))

    flops = 2 * B * (S * H + H * H + H * 2 * AP)
    transcendentals = B * 2 * AP                # one tanh OR exp per output element
    bytes_accessed = nbytes(x_in) + weight_bytes + B * 2 * AP * 4

    def const_spec(a):
        # weights/biases: same block every grid step -> keep VMEM-resident and
        # single-buffered (double-buffering a constant block only wastes VMEM).
        return pl.BlockSpec(a.shape, lambda i: (0, 0),
                            pipeline_mode=pl.Buffered(1))

    out = pl.pallas_call(
        _make_kernel(H, AP),
        out_shape=jax.ShapeDtypeStruct((B, 2 * AP), jnp.float32),
        grid=(nb,),
        in_specs=[
            pl.BlockSpec((TB, S), lambda i: (i, 0)),    # x: tiled over batch
            const_spec(w1),
            const_spec(w2),
            const_spec(w3),
            const_spec(bp),                             # packed lane-padded biases
        ],
        out_specs=pl.BlockSpec((TB, 2 * AP), lambda i: (i, 0)),
        compiler_params=pltpu.CompilerParams(
            dimension_semantics=("parallel",),          # megacore-shardable batch
            vmem_limit_bytes=vmem_limit),
        cost_estimate=pl.CostEstimate(
            flops=flops, transcendentals=transcendentals,
            bytes_accessed=bytes_accessed),
    )(x_in, w1, w2, w3, bp)

    x_m = out[:, :A]
    x_v = out[:, AP:AP + A]
    return x_m, x_v


def init_policy_params(key, state_dim, hidden_dim, action_dim):
    """nn.Linear-style init U(-1/sqrt(fan_in), 1/sqrt(fan_in)).
    Weights stored transposed: (in_features, out_features)."""
    def linear(k, fan_in, fan_out):
        kw, kb = jax.random.split(k)
        bound = 1.0 / math.sqrt(fan_in)
        w = jax.random.uniform(kw, (fan_in, fan_out), jnp.float32, -bound, bound)
        b = jax.random.uniform(kb, (1, fan_out), jnp.float32, -bound, bound)
        return w, b

    ks = jax.random.split(key, 4)
    w1, b1 = linear(ks[0], state_dim, hidden_dim)
    w2, b2 = linear(ks[1], hidden_dim, hidden_dim)
    w3m, b3m = linear(ks[2], hidden_dim, action_dim)
    w3v, b3v = linear(ks[3], hidden_dim, action_dim)
    return (w1, b1, w2, b2, w3m, b3m, w3v, b3v)


def pack_params(raw, weight_dtype=jnp.float32):
    """Fuse & lane-pad the two head linears and pack all biases into one (4, L)
    lane-padded buffer (rows: b1, b2, b3m, b3v). Weights may be stored in bf16
    (the MXU is bf16-native on v5e/v6e/v7x); biases stay f32."""
    w1, b1, w2, b2, w3m, b3m, w3v, b3v = raw
    H = w1.shape[1]
    A = w3m.shape[1]
    AP = _round_up(A, 128)
    L = _round_up(max(H, AP), 128)

    pad_cols = lambda a, n: jnp.pad(a, ((0, 0), (0, n - a.shape[1])))
    w3 = jnp.concatenate([pad_cols(w3m, AP), pad_cols(w3v, AP)], axis=1)
    bp = jnp.concatenate([pad_cols(b1, L), pad_cols(b2, L),
                          pad_cols(b3m, L), pad_cols(b3v, L)],
                         axis=0).astype(jnp.float32)
    return (w1.astype(weight_dtype), w2.astype(weight_dtype),
            w3.astype(weight_dtype), bp)


def policy_forward_ref(x, raw):
    """Pure-JAX reference (matches the PyTorch uncertain=True forward, eval mode)."""
    w1, b1, w2, b2, w3m, b3m, w3v, b3v = raw
    h = x @ w1 + b1
    h = jnp.where(h >= 0, h, 0.001 * h)
    h = h @ w2 + b2
    h = jnp.where(h >= 0, h, 0.001 * h)
    x_m = jnp.tanh(h @ w3m + b3m)
    x_v = jnp.exp(h @ w3v + b3v)
    return x_m, x_v


if __name__ == "__main__":
    # small shapes consistent with the module: state=16, hidden=32, action=4
    state_dim, hidden_dim, action_dim = 16, 32, 4

    key = jax.random.PRNGKey(0)
    kx, kp, kx2 = jax.random.split(key, 3)
    raw = init_policy_params(kp, state_dim, hidden_dim, action_dim)

    # --- f32 path, single-block batch (B=8): strict check vs reference ------
    B = 8
    x = jax.random.normal(kx, (B, state_dim), jnp.float32)
    params_f32 = pack_params(raw, jnp.float32)
    x_m, x_v = policy_forward(x, params_f32, hidden_dim, action_dim)
    jax.block_until_ready((x_m, x_v))

    x_m_r, x_v_r = policy_forward_ref(x, raw)
    assert x_m.shape == (B, action_dim) and x_v.shape == (B, action_dim)
    assert jnp.allclose(x_m, x_m_r, atol=1e-5, rtol=1e-5)
    assert jnp.allclose(x_v, x_v_r, atol=1e-5, rtol=1e-5)
    assert bool(jnp.all(x_v > 0))            # exp head must be positive

    # --- f32 path, multi-block batch (B=64 -> 2 grid blocks / megacore) -----
    B2 = 64
    x2 = jax.random.normal(kx2, (B2, state_dim), jnp.float32)
    x_m2, x_v2 = policy_forward(x2, params_f32, hidden_dim, action_dim)
    jax.block_until_ready((x_m2, x_v2))
    x_m2_r, x_v2_r = policy_forward_ref(x2, raw)
    assert jnp.allclose(x_m2, x_m2_r, atol=1e-5, rtol=1e-5)
    assert jnp.allclose(x_v2, x_v2_r, atol=1e-5, rtol=1e-5)

    # --- bf16 weight + activation path: loose tolerance ---------------------
    params_bf16 = pack_params(raw, jnp.bfloat16)
    x_m_b, x_v_b = policy_forward(x, params_bf16, hidden_dim, action_dim)
    jax.block_until_ready((x_m_b, x_v_b))
    assert jnp.allclose(x_m_b, x_m_r, atol=1e-1, rtol=1e-1)
    assert jnp.allclose(x_v_b, x_v_r, atol=1e-1, rtol=1e-1)

    print("KERNEL_OK")
</pallas_src>

<mosaic_0001>
module attributes {stable_mosaic.version = 11 : i64} {
  func.func @kernel(%arg0: i32, %arg1: memref<8x16xf32, #tpu.memory_space<vmem>>, %arg2: memref<16x32xf32, #tpu.memory_space<vmem>>, %arg3: memref<32x32xf32, #tpu.memory_space<vmem>>, %arg4: memref<32x256xf32, #tpu.memory_space<vmem>>, %arg5: memref<4x128xf32, #tpu.memory_space<vmem>>, %arg6: memref<8x256xf32, #tpu.memory_space<vmem>>) attributes {dimension_semantics = [#tpu.dimension_semantics<parallel>], iteration_bounds = array<i64: 1>, scalar_prefetch = 0 : i64, scratch_operands = 0 : i64, tpu.core_type = #tpu.core_type<tc>, window_params = [{transform_indices = @transform_0, window_bounds = array<i64: 8, 16>}, {pipeline_mode = #tpu.pipeline_mode<synchronous>, transform_indices = @transform_1, window_bounds = array<i64: 16, 32>}, {pipeline_mode = #tpu.pipeline_mode<synchronous>, transform_indices = @transform_2, window_bounds = array<i64: 32, 32>}, {pipeline_mode = #tpu.pipeline_mode<synchronous>, transform_indices = @transform_3, window_bounds = array<i64: 32, 256>}, {pipeline_mode = #tpu.pipeline_mode<synchronous>, transform_indices = @transform_4, window_bounds = array<i64: 4, 128>}, {transform_indices = @transform_5, window_bounds = array<i64: 8, 256>}]} {
    %c0 = arith.constant 0 : index
    %c0_0 = arith.constant 0 : index
    %0 = vector.load %arg5[%c0, %c0_0] : memref<4x128xf32, #tpu.memory_space<vmem>>, vector<4x128xf32>
    %1 = vector.extract_strided_slice %0 {offsets = [0, 0], sizes = [1, 32], strides = [1, 1]} : vector<4x128xf32> to vector<1x32xf32>
    %2 = vector.extract_strided_slice %0 {offsets = [1, 0], sizes = [1, 32], strides = [1, 1]} : vector<4x128xf32> to vector<1x32xf32>
    %3 = vector.extract_strided_slice %0 {offsets = [2, 0], sizes = [1, 128], strides = [1, 1]} : vector<4x128xf32> to vector<1x128xf32>
    %4 = vector.extract_strided_slice %0 {offsets = [3, 0], sizes = [1, 128], strides = [1, 1]} : vector<4x128xf32> to vector<1x128xf32>
    %c0_1 = arith.constant 0 : index
    %c0_2 = arith.constant 0 : index
    %5 = vector.load %arg1[%c0_1, %c0_2] : memref<8x16xf32, #tpu.memory_space<vmem>>, vector<8x16xf32>
    %c0_3 = arith.constant 0 : index
    %c0_4 = arith.constant 0 : index
    %6 = vector.load %arg2[%c0_3, %c0_4] : memref<16x32xf32, #tpu.memory_space<vmem>>, vector<16x32xf32>
    %cst = arith.constant dense<0.000000e+00> : vector<8x32xf32>
    %7 = tpu.matmul %5, %6, %cst {dimension_numbers = #tpu.dot_dimension_numbers<[1], [0], [0], [1], [0, 0, 1, 1], [], []>} : vector<8x16xf32>, vector<16x32xf32>, vector<8x32xf32> -> vector<8x32xf32>
    %8 = vector.broadcast %1 : vector<1x32xf32> to vector<8x32xf32>
    %9 = arith.addf %7, %8 : vector<8x32xf32>
    %cst_5 = arith.constant 0.000000e+00 : f32
    %10 = vector.broadcast %cst_5 : f32 to vector<8x32xf32>
    %11 = arith.cmpf oge, %9, %10 : vector<8x32xf32>
    %cst_6 = arith.constant 1.000000e-03 : f32
    %12 = vector.broadcast %cst_6 : f32 to vector<8x32xf32>
    %13 = arith.mulf %12, %9 : vector<8x32xf32>
    %14 = arith.select %11, %9, %13 : vector<8x32xi1>, vector<8x32xf32>
    %c0_7 = arith.constant 0 : index
    %c0_8 = arith.constant 0 : index
    %15 = vector.load %arg3[%c0_7, %c0_8] : memref<32x32xf32, #tpu.memory_space<vmem>>, vector<32x32xf32>
    %cst_9 = arith.constant dense<0.000000e+00> : vector<8x32xf32>
    %16 = tpu.matmul %14, %15, %cst_9 {dimension_numbers = #tpu.dot_dimension_numbers<[1], [0], [0], [1], [0, 0, 1, 1], [], []>} : vector<8x32xf32>, vector<32x32xf32>, vector<8x32xf32> -> vector<8x32xf32>
    %17 = vector.broadcast %2 : vector<1x32xf32> to vector<8x32xf32>
    %18 = arith.addf %16, %17 : vector<8x32xf32>
    %cst_10 = arith.constant 0.000000e+00 : f32
    %19 = vector.broadcast %cst_10 : f32 to vector<8x32xf32>
    %20 = arith.cmpf oge, %18, %19 : vector<8x32xf32>
    %cst_11 = arith.constant 1.000000e-03 : f32
    %21 = vector.broadcast %cst_11 : f32 to vector<8x32xf32>
    %22 = arith.mulf %21, %18 : vector<8x32xf32>
    %23 = arith.select %20, %18, %22 : vector<8x32xi1>, vector<8x32xf32>
    %c0_12 = arith.constant 0 : index
    %c0_13 = arith.constant 0 : index
    %24 = vector.load %arg4[%c0_12, %c0_13] : memref<32x256xf32, #tpu.memory_space<vmem>>, vector<32x256xf32>
    %cst_14 = arith.constant dense<0.000000e+00> : vector<8x256xf32>
    %25 = tpu.matmul %23, %24, %cst_14 {dimension_numbers = #tpu.dot_dimension_numbers<[1], [0], [0], [1], [0, 0, 1, 1], [], []>} : vector<8x32xf32>, vector<32x256xf32>, vector<8x256xf32> -> vector<8x256xf32>
    %26 = vector.extract_strided_slice %25 {offsets = [0, 0], sizes = [8, 128], strides = [1, 1]} : vector<8x256xf32> to vector<8x128xf32>
    %27 = vector.broadcast %3 : vector<1x128xf32> to vector<8x128xf32>
    %28 = arith.addf %26, %27 : vector<8x128xf32>
    %29 = math.tanh %28 : vector<8x128xf32>
    %c0_15 = arith.constant 0 : index
    %c0_16 = arith.constant 0 : index
    %30 = vector.load %arg6[%c0_15, %c0_16] : memref<8x256xf32, #tpu.memory_space<vmem>>, vector<8x128xf32>
    tpu.vector_store %arg6[%c0_15, %c0_16], %29 {strides = array<i32>} : memref<8x256xf32, #tpu.memory_space<vmem>>, vector<8x128xf32>,
    %31 = vector.extract_strided_slice %25 {offsets = [0, 128], sizes = [8, 128], strides = [1, 1]} : vector<8x256xf32> to vector<8x128xf32>
    %32 = vector.broadcast %4 : vector<1x128xf32> to vector<8x128xf32>
    %33 = arith.addf %31, %32 : vector<8x128xf32>
    %34 = math.exp %33 : vector<8x128xf32>
    %c0_17 = arith.constant 0 : index
    %c128 = arith.constant 128 : index
    %35 = vector.load %arg6[%c0_17, %c128] : memref<8x256xf32, #tpu.memory_space<vmem>>, vector<8x128xf32>
    tpu.vector_store %arg6[%c0_17, %c128], %34 {strides = array<i32>} : memref<8x256xf32, #tpu.memory_space<vmem>>, vector<8x128xf32>,
    return
  }
  func.func @transform_0(%arg0: i32) -> (i32, i32) {
    %c0_i32 = arith.constant 0 : i32
    %c0_i32_0 = arith.constant 0 : i32
    return %arg0, %c0_i32 : i32, i32
  }
  func.func @transform_1(%arg0: i32) -> (i32, i32) {
    %c0_i32 = arith.constant 0 : i32
    %c0_i32_0 = arith.constant 0 : i32
    %c0_i32_1 = arith.constant 0 : i32
    return %c0_i32, %c0_i32_0 : i32, i32
  }
  func.func @transform_2(%arg0: i32) -> (i32, i32) {
    %c0_i32 = arith.constant 0 : i32
    %c0_i32_0 = arith.constant 0 : i32
    %c0_i32_1 = arith.constant 0 : i32
    return %c0_i32, %c0_i32_0 : i32, i32
  }
  func.func @transform_3(%arg0: i32) -> (i32, i32) {
    %c0_i32 = arith.constant 0 : i32
    %c0_i32_0 = arith.constant 0 : i32
    %c0_i32_1 = arith.constant 0 : i32
    return %c0_i32, %c0_i32_0 : i32, i32
  }
  func.func @transform_4(%arg0: i32) -> (i32, i32) {
    %c0_i32 = arith.constant 0 : i32
    %c0_i32_0 = arith.constant 0 : i32
    %c0_i32_1 = arith.constant 0 : i32
    return %c0_i32, %c0_i32_0 : i32, i32
  }
  func.func @transform_5(%arg0: i32) -> (i32, i32) {
    %c0_i32 = arith.constant 0 : i32
    %c0_i32_0 = arith.constant 0 : i32
    return %arg0, %c0_i32 : i32, i32
  }
}

</mosaic_0001>

<bundles_post_ra>
// kernel: tpu_custom_call.1
= control target key start
LH: loop header
LB: loop body
LE: loop exit
PB: predicated region body
PF: predicated region fallthrough
CT: control target
= control target key end

     0   :  { %10 = vsyncpa [#allocation3], 0  ;;  %s651_s0 = inlined_call_operand.hbm [shape: f32[8,16], index: 0, kind: input, shape index: {}]   ;;  %s652_s1 = inlined_call_operand.hbm [shape: f32[16,32], index: 1, kind: input, shape index: {}]   ;;  %s653_s2 = inlined_call_operand.hbm [shape: f32[32,32], index: 2, kind: input, shape index: {}]   ;;  %s654_s3 = inlined_call_operand.hbm [shape: f32[32,256], index: 3, kind: input, shape index: {}]   ;;  %s655_s4 = inlined_call_operand.vmem [shape: f32[4,128], index: 4, kind: input, shape index: {}]   ;;  %s656_s5 = inlined_call_operand.hbm [shape: f32[8,256], index: 5, kind: output, shape index: {}]  }
   0x1   :  { %11 = vsyncpa [#allocation6], 0 }
   0x2   :  { %12 = vsyncpa [#allocation9], 0 }
   0x3   :  { %13 = vsyncpa [#allocation4], 0  ;;  %s538_s18 = smov [#allocation5]   ;;  %s420_s22 = scalar_lea.hbm %s652_s1, 256 }
   0x4   :  { %s29_s19 = sshll.u32 %s538_s18, 4  ;;  %p421_p0 = scmp.ne.s32.totalorder %s652_s1, %s420_s22  ;;  %s30_s19 = int_to_ptr.vmem [resolvable:$true] %s29_s19 }
   0x5   :  { %p424_p1 = scmp.lt.u32.totalorder %s420_s22, %s652_s1 }
   0x7   :  { %p426_p2 = pnand %p424_p1, %p421_p0 }
   0x9   :  { %429 = shalt.err (!%p426_p2)
}
   0xa   :  { %s430_s27 = scalar_lea.vmem %s30_s19, 256  ;;  %p435_p4 = scmp.lt.s32.totalorder %s30_s19, %s30_s19 }
   0xb   :  { %p431_p3 = scmp.ne.s32.totalorder %s30_s19, %s430_s27  ;;  %p436_p5 = scmp.lt.s32.totalorder %s430_s27, %s430_s27 }
   0xd   :  { %p437_p6 = por %p436_p5, %p435_p4 }
   0xf   :  { %p438_p7 = pnand %p437_p6, %p431_p3 }
  0x11   :  { %441 = shalt.err (!%p438_p7)
}
  0x12   :  { %s539_s28 = smov 128   ;;  %s540_s29 = smov 8  }
  0x13   :  { %35 = dma.hbm_to_vmem [thread:$0]  %s652_s1, 256, %s30_s19, [#allocation6], %s539_s28, %s539_s28, %s540_s29  }
  0x14   :  { %s541_s7 = smov [#allocation2]   ;;  %s542_s9 = smov [#allocation7]  }
  0x15   :  { %s20_s8 = sshll.u32 %s541_s7, 4  ;;  %s41_s10 = sshll.u32 %s542_s9, 4  ;;  %s21_s8 = int_to_ptr.vmem [resolvable:$true] %s20_s8  ;;  %s42_s10 = int_to_ptr.vmem [resolvable:$true] %s41_s10 }
  0x16   :  { %s442_s13 = scalar_lea.hbm %s651_s0, 128 }
  0x17   :  { %p443_p8 = scmp.ne.s32.totalorder %s651_s0, %s442_s13  ;;  %p446_p9 = scmp.lt.u32.totalorder %s442_s13, %s651_s0 }
  0x19   :  { %p448_p10 = pnand %p446_p9, %p443_p8 }
  0x1b   :  { %451 = shalt.err (!%p448_p10)
}
  0x1c   :  { %s452_s1 = scalar_lea.vmem %s21_s8, 128  ;;  %p457_p12 = scmp.lt.s32.totalorder %s21_s8, %s21_s8 }
  0x1d   :  { %p453_p11 = scmp.ne.s32.totalorder %s21_s8, %s452_s1  ;;  %p458_p13 = scmp.lt.s32.totalorder %s452_s1, %s452_s1 }
  0x1f   :  { %p459_p0 = por %p458_p13, %p457_p12 }
  0x21   :  { %p460_p1 = pnand %p459_p0, %p453_p11 }
  0x23   :  { %463 = shalt.err (!%p460_p1)
}
  0x24   :  { %23 = dma.hbm_to_vmem [thread:$0]  %s651_s0, 128, %s21_s8, [#allocation3]  }
  0x25   :  { %s464_s22 = scalar_lea.hbm %s653_s2, 512 }
  0x26   :  { %p465_p2 = scmp.ne.s32.totalorder %s653_s2, %s464_s22  ;;  %p468_p3 = scmp.lt.u32.totalorder %s464_s22, %s653_s2 }
  0x28   :  { %p470_p4 = pnand %p468_p3, %p465_p2 }
  0x2a   :  { %473 = shalt.err (!%p470_p4)
}
  0x2b   :  { %s474_s27 = scalar_lea.vmem %s42_s10, 512  ;;  %p479_p6 = scmp.lt.s32.totalorder %s42_s10, %s42_s10 }
  0x2c   :  { %p475_p5 = scmp.ne.s32.totalorder %s42_s10, %s474_s27  ;;  %p480_p7 = scmp.lt.s32.totalorder %s474_s27, %s474_s27 }
  0x2e   :  { %p481_p8 = por %p480_p7, %p479_p6 }
  0x30   :  { %p482_p9 = pnand %p481_p8, %p475_p5 }
  0x32   :  { %485 = shalt.err (!%p482_p9)
}
  0x33   :  { %47 = dma.hbm_to_vmem [thread:$0]  %s653_s2, 512, %s42_s10, [#allocation6], %s539_s28, %s539_s28, %s540_s29  }
  0x34   :  { %s543_s6 = smov [#allocation8]   ;;  %s486_s11 = scalar_lea.hbm %s654_s3, 1024 }
  0x35   :  { %s53_s7 = sshll.u32 %s543_s6, 4  ;;  %p487_p10 = scmp.ne.s32.totalorder %s654_s3, %s486_s11  ;;  %s54_s7 = int_to_ptr.vmem [resolvable:$true] %s53_s7 }
  0x36   :  { %p490_p11 = scmp.lt.u32.totalorder %s486_s11, %s654_s3 }
  0x38   :  { %p492_p12 = pnand %p490_p11, %p487_p10 }
  0x3a   :  { %495 = shalt.err (!%p492_p12)
}
  0x3b   :  { %s496_s16 = scalar_lea.vmem %s54_s7, 1024  ;;  %p501_p0 = scmp.lt.s32.totalorder %s54_s7, %s54_s7 }
  0x3c   :  { %p497_p13 = scmp.ne.s32.totalorder %s54_s7, %s496_s16  ;;  %p502_p1 = scmp.lt.s32.totalorder %s496_s16, %s496_s16 }
  0x3e   :  { %p503_p2 = por %p502_p1, %p501_p0 }
  0x40   :  { %p504_p3 = pnand %p503_p2, %p497_p13 }
  0x42   :  { %507 = shalt.err (!%p504_p3)
}
  0x43   :  { %s544_s2 = smov 256   ;;  %s545_s28 = smov 16  }
  0x44   :  { %59 = dma.hbm_to_vmem [thread:$0]  %s654_s3, 1024, %s54_s7, [#allocation9], %s544_s2, %s544_s2, %s545_s28  }
  0x45   :  { %530 = dma.done.wait [#allocation3], 128  }
  0x46   :  { %531 = vsyncadd [#allocation3], 4294967168 }
  0x47   :  { %532 = dma.done.wait [#allocation6], 768  }
  0x48   :  { %533 = vsyncadd [#allocation6], 4294966528 }
  0x49   :  { %534 = dma.done.wait [#allocation9], 1024  }
  0x4a   :  { %535 = vsyncadd [#allocation9], 4294966272  ;;  %v546_v0 = vmov 0.0|0.0   ;;  %vm547_vm0 = vmmov 0   ;;  %v548_v1 = vmov 0.0   ;;  %v76_v2 = vld [vmem:[#allocation5] sm:$0xff]  ;;  %v78_v18 = vlaneseq }
  0x4b   :  { %387 = vmatprep.subr.bf16.mxu0 %v546_v0  ;;  %373 = vmatprep.mubr.msk.f32.mxu0 %vm547_vm0, %v548_v1  ;;  %v77_v3 = vld [vmem:[#allocation5 + $0x8] sm:$0xff]  ;;  %v159_v5 = vld [vmem:[#allocation7] sm:$0xff]  ;;  %v160_v6 = vld [vmem:[#allocation7 + $0x8] sm:$0xff]  ;;  %vm82_vm1 = vcmask 130048   ;;  %vm167_vm3 = vcmask 261120  }
  0x4c   :  { %390 = vmatprep.subr.bf16.mxu1 %v546_v0  ;;  %384 = vmatprep.mubr.msk.f32.mxu1 %vm547_vm0, %v548_v1  ;;  %v388_v4 = vpack.c.bf16 %v77_v3, %v76_v2  ;;  %v391_v7 = vpack.c.bf16 %v160_v6, %v159_v5  ;;  %v75_v8 = vld [vmem:[#allocation2] sm:$0xff]  ;;  %v161_v9 = vld [vmem:[#allocation7 + $0x10] sm:$0xff]  ;;  %v162_v10 = vld [vmem:[#allocation7 + $0x18] sm:$0xff]  ;;  %v79_v19 = vshrl.u32 %v78_v18, 7 }
  0x4d   :  { %v394_v11 = vpack.c.bf16 %v162_v10, %v161_v9  ;;  %v245_v12 = vld [vmem:[#allocation8 + $0x8] sm:$0xff]  ;;  %v247_v13 = vld [vmem:[#allocation8 + $0x18] sm:$0xff]  ;;  %v244_v14 = vld [vmem:[#allocation8] sm:$0xff] }
  0x4e   :  { %389 = vmatpush3.bf16.msra.mxu0 %v388_v4  ;;  %392 = vmatpush3.bf16.msra.mxu1 %v391_v7  ;;  %v396_v15 = vpack.c.bf16 %v247_v13, %v245_v12  ;;  %v246_v16 = vld [vmem:[#allocation8 + $0x10] sm:$0xff]  ;;  %v80_v20 = vsub.s32 0, %v79_v19  ;;  %v74_v21 = vld [vmem:[%s655_s4] sm:$0xf]  ;;  %v251_v29 = vld [vmem:[#allocation8 + $0x38] sm:$0xff]  ;;  %v165_v34 = vsub.s32 1, %v79_v19 }
  0x4f   :  { %393 = vmatprep.subr.bf16.mxu1 %v546_v0  ;;  %v398_v17 = vpack.c.bf16 %v246_v16, %v244_v14  ;;  %v249_v28 = vld [vmem:[#allocation8 + $0x28] sm:$0xff]  ;;  %v248_v31 = vld [vmem:[#allocation8 + $0x20] sm:$0xff]  ;;  %v250_v32 = vld [vmem:[#allocation8 + $0x30] sm:$0xff]  ;;  %v328_v41 = vsub.s32 2, %v79_v19  ;;  %v335_v42 = vsub.s32 3, %v79_v19  ;;  %s549_s4 = smov [#allocation10]  }
  0x50   :  { %397 = vmatprep.subr.bf16.mxu0 %v396_v15  ;;  %v81_v22 = vrot.slane %v74_v21, %v80_v20  ;;  %v400_v30 = vpack.c.bf16 %v251_v29, %v249_v28  ;;  %v402_v33 = vpack.c.bf16 %v250_v32, %v248_v31  ;;  %v166_v35 = vrot.slane %v74_v21, %v165_v34  ;;  %s347_s1 = sshll.u32 %s549_s4, 4  ;;  %s348_s1 = int_to_ptr.vmem [resolvable:$true] %s347_s1 }
  0x51   :  { %374 = vmatmul.mubr.msk.f32.vlgmr.msra.gmra.mrb[0].mxu0 %vm82_vm1, %v75_v8  ;;  %v329_v43 = vrot.slane %v74_v21, %v328_v41  ;;  %v336_v44 = vrot.slane %v74_v21, %v335_v42  ;;  %s508_s18 = scalar_lea.vmem %s348_s1, 256  ;;  %p513_p5 = scmp.lt.s32.totalorder %s348_s1, %s348_s1 }
  0x52   :  { %319 = vmatprep.mubr.f32.mxu0 %v548_v1  ;;  %395 = vmatpush3.bf16.msra.mxu1 %v394_v11  ;;  %p509_p4 = scmp.ne.s32.totalorder %s348_s1, %s508_s18  ;;  %p514_p6 = scmp.lt.s32.totalorder %s508_s18, %s508_s18 }
  0x53   :  { %399 = vmatpush1.bf16.msra.mxu0 %v398_v17 }
  0x54   :  { %401 = vmatprep.subr.bf16.mxu0 %v400_v30  ;;  %p515_p7 = por %p514_p6, %p513_p5 }
  0x56   :  { %p516_p8 = pnand %p515_p7, %p509_p4 }
  0x57   :  { %403 = vmatpush1.bf16.msra.mxu0 %v402_v33 }
 0x124   :  { %v152_v23 = vpop.f32.mrb[0].mxu0 }
 0x125   :  { %v153_v24 = vadd.f32 %v152_v23, %v81_v22  ;;  %v375_v25 = vpop.f32.mrb[1].mxu0 }
 0x127   :  { %vm156_vm2 = vcmp.ge.f32.partialorder %v153_v24, 0.0  ;;  %v157_v26 = vmul.f32 0.001, %v153_v24 }
 0x129   :  { %v158_v27 = vsel %vm156_vm2, %v153_v24, %v157_v26 }
 0x12a   :  { %385 = vmatmul.mubr.msk.f32.vlgmr.msra.gmra.mrb[0].mxu1 %vm167_vm3, %v158_v27 }
 0x1fd   :  { %v237_v36 = vpop.f32.mrb[0].mxu1 }
 0x1fe   :  { %v238_v37 = vadd.f32 %v237_v36, %v166_v35  ;;  %v386_v38 = vpop.f32.mrb[1].mxu1 }
 0x200   :  { %vm241_vm4 = vcmp.ge.f32.partialorder %v238_v37, 0.0  ;;  %v242_v39 = vmul.f32 0.001, %v238_v37 }
 0x202   :  { %v243_v40 = vsel %vm241_vm4, %v238_v37, %v242_v39 }
 0x203   :  { %360 = vmatmul.mubr.msk.f32.vlgmr.msra.gmra.mrb[2].mxu0 %vm167_vm3, %v243_v40 }
 0x2d6   :  { %v321_v45 = vpop.f32.mrb[2].mxu0 }
 0x2d7   :  { %v330_v46 = vadd.f32 %v329_v43, %v321_v45  ;;  %v323_v47 = vpop.f32.mrb[3].mxu0 }
 0x2d8   :  { %v337_v48 = vadd.f32 %v336_v44, %v323_v47 }
 0x2d9   :  { %416 = vtanh.f32 %v330_v46 }
 0x2da   :  { %v338_v49 = vmul.f32 1.442695, %v337_v48 }
 0x2dc   :  { %418 = vpow2.f32 %v338_v49 }
 0x2e3   :  { %v417_v50 = vpop.eup %416 }
 0x2e4   :  { %332 = vst [vmem:[#allocation10] sm:$0xff] %v417_v50 }
 0x2e6   :  { %v419_v51 = vpop.eup %418 }
 0x2e7   :  { %340 = vst [vmem:[#allocation10 + $0x8] sm:$0xff] %v419_v51 }
 0x2e8   :  { %519 = shalt.err (!%p516_p8)
}
 0x2e9   :  { %s520_s21 = scalar_lea.hbm %s656_s5, 256 }
 0x2ea   :  { %p521_p9 = scmp.ne.s32.totalorder %s656_s5, %s520_s21  ;;  %p524_p10 = scmp.lt.u32.totalorder %s520_s21, %s656_s5 }
 0x2ec   :  { %p526_p11 = pnand %p524_p10, %p521_p9 }
 0x2ee   :  { %529 = shalt.err (!%p526_p11)
}
 0x2ef   :  { %350 = dma.vmem_to_hbm [thread:$0]  %s348_s1, 256, %s656_s5, [#allocation4]  }
 0x2f0   :  { %536 = dma.done.wait [#allocation4], 256  }
 0x2f1   :  { %537 = vsyncadd [#allocation4], 4294967040 }
 0x2f2   :  { %354 = vsyncpa [#allocation3], 1 }
 0x2f3   :  { %355 = vsyncpa [#allocation6], 1 }
 0x2f4   :  { %356 = vsyncpa [#allocation9], 1 }
 0x2f5   :  { %357 = vsyncpa [#allocation4], 1 }

</bundles_post_ra>
